<compile_context>
chip_gen: v5e
topology: v5e:2x2
jax: 0.10.0
libtpu: 0.0.40
codegen_flags: <defaults>
</compile_context>

<pallas_src>
import functools

import jax
import jax.numpy as jnp
from jax.experimental import pallas as pl
from jax.experimental.pallas import tpu as pltpu

HIDDEN = 128
LN_EPS = 1e-5
LEAKY_SLOPE = 0.2

# Per-TensorCore VMEM budget used to size tiles and the compiler limit.
# 48 MiB leaves headroom on v7x (64 MiB physical per TC) and is well under
# the 128 MiB of v5e / v6e.
VMEM_BUDGET = 48 * 1024 * 1024
VMEM_SLACK = 6 * 1024 * 1024  # f32 intermediates, params, compiler scratch


def _cdiv(a, b):
    return -(-a // b)


def _round_up(x, m):
    return _cdiv(x, m) * m


def _discriminator_kernel(x_ref, w1_ref, b1_ref, w2row_ref, b2_ref, o_ref):
    # --- fc1 on the MXU: (tb, n_pad) @ (n_pad, 128), f32 accumulation ---
    h = jnp.dot(x_ref[...], w1_ref[...], preferred_element_type=jnp.float32)
    h = h + b1_ref[...]

    # --- LeakyReLU(0.2): slope < 1 so max(h, 0.2*h) == leaky_relu(h) ---
    h = jnp.maximum(h, LEAKY_SLOPE * h)

    # --- LayerNorm over the 128 features (biased variance, eps=1e-5).
    #     Affine (gamma/beta) is folded into w2row/b2 in the wrapper. ---
    mean = jnp.mean(h, axis=-1, keepdims=True)
    centered = h - mean
    var = jnp.mean(centered * centered, axis=-1, keepdims=True)
    hn = centered * jax.lax.rsqrt(var + LN_EPS)

    # --- fc2 as VPU multiply + lane reduce (avoids an N=1 MXU matmul),
    #     then a (tb,1) -> (1,tb) transpose (XLU) for a lane-dense store ---
    logits = jnp.sum(hn * w2row_ref[...], axis=-1, keepdims=True) + b2_ref[0, 0]
    o_ref[...] = jnp.transpose(jax.nn.sigmoid(logits))


def _pick_batch_tile(B, tile_b, n_pad, bytes_x):
    """Balanced, VMEM-budgeted batch tile (multiple of 16 for bf16 packing)."""
    # Enough tiles that (a) no tile exceeds tile_b and (b) large-B workloads
    # get a >=2-step grid so both v7x TensorCores have work.
    n_tiles = _cdiv(B, tile_b)
    if n_tiles == 1 and B >= 256:
        n_tiles = 2
    tb = _round_up(_cdiv(B, n_tiles), 16)
    # Bump to a multiple of 128 (fully unmasked output stores) when that costs
    # at most ~12.5% extra padded rows.
    tb128 = _round_up(tb, 128)
    if tb >= 128 and n_tiles * (tb128 - tb) * 8 <= B:
        tb = tb128
    # Cap by the VMEM budget: resident W1 + double-buffered x tile must fit.
    w1_bytes = bytes_x * n_pad * HIDDEN
    tb_cap = (VMEM_BUDGET - VMEM_SLACK - w1_bytes) // (2 * bytes_x * n_pad)
    tb_cap = max(16, (tb_cap // 16) * 16)
    # TODO(synk): if W1 alone busts the budget (very large n_cities, esp. on
    # v7x's 64 MiB/TC), add a K-reduction grid axis with a VMEM f32
    # accumulator and move LeakyReLU/LN/fc2/sigmoid into a pl.when epilogue.
    return max(16, min(tb, tb_cap, _round_up(tile_b, 16)))


@functools.partial(jax.jit, static_argnames=("tile_b", "use_bf16"))
def discriminator_forward(x, params, *, tile_b=1024, use_bf16=True):
    """x: (B, 1, n_cities) float32 -> (B, 1) float32."""
    x2d = jnp.squeeze(x, axis=1)                        # mirrors x.squeeze(1)
    B, n_cities = x2d.shape
    w1, b1, w2, b2, gamma, beta = params

    # Fold the LayerNorm affine into fc2 (exact: LN-affine followed by linear).
    w2_row = (w2[:, 0] * gamma[0]).reshape(1, HIDDEN)   # (1, 128) f32
    b2_s = (b2 + beta @ w2).reshape(1, 1)               # (1, 1) scalar

    # Pad the contraction dim to a multiple of 128 (zero cols of x / zero rows
    # of W1 -- numerically exact) so x and W1 tiles are lane-dense.
    n_pad = _round_up(n_cities, 128)
    if n_pad != n_cities:
        x2d = jnp.pad(x2d, ((0, 0), (0, n_pad - n_cities)))
        w1 = jnp.pad(w1, ((0, n_pad - n_cities), (0, 0)))

    # bf16 on the HBM-bound x stream (and W1): halves bytes and avoids the
    # multi-pass f32 MXU path.  Accumulation / LN / sigmoid stay f32.
    x_dtype = jnp.bfloat16 if use_bf16 else jnp.float32
    x2d = x2d.astype(x_dtype)
    w1 = w1.astype(x_dtype)
    bytes_x = 2 if use_bf16 else 4

    tb = _pick_batch_tile(B, tile_b, n_pad, bytes_x)
    b_pad = _round_up(B, tb)
    if b_pad != B:
        x2d = jnp.pad(x2d, ((0, b_pad - B), (0, 0)))
    n_tiles = b_pad // tb

    out = pl.pallas_call(
        _discriminator_kernel,
        # Lane-dense output: one (1, tb) row of probabilities per grid step.
        out_shape=jax.ShapeDtypeStruct((n_tiles, tb), jnp.float32),
        grid=(n_tiles,),
        in_specs=[
            # x: tiled over batch, double-buffered by the pipeline.
            pl.BlockSpec((tb, n_pad), lambda i: (i, 0)),
            # weights: constant block index -> stay resident in VMEM.
            pl.BlockSpec((n_pad, HIDDEN), lambda i: (0, 0)),
            pl.BlockSpec((1, HIDDEN), lambda i: (0, 0)),
            pl.BlockSpec((1, HIDDEN), lambda i: (0, 0)),
            # fused scalar bias in SMEM.
            pl.BlockSpec(memory_space=pltpu.SMEM),
        ],
        out_specs=pl.BlockSpec((1, tb), lambda i: (i, 0)),
        compiler_params=pltpu.CompilerParams(
            dimension_semantics=("parallel",),
            vmem_limit_bytes=VMEM_BUDGET,
        ),
    )(x2d, w1, b1, w2_row, b2_s)

    return out.reshape(-1)[:B].reshape(B, 1)


def init_params(key, n_cities):
    """Deterministic init matching nn.Linear shapes (stored transposed)."""
    k1, k2, k3, k4 = jax.random.split(key, 4)
    lim1 = 1.0 / jnp.sqrt(n_cities)
    lim2 = 1.0 / jnp.sqrt(HIDDEN)
    w1 = jax.random.uniform(k1, (n_cities, HIDDEN), jnp.float32, -lim1, lim1)
    b1 = jax.random.uniform(k2, (1, HIDDEN), jnp.float32, -lim1, lim1)
    w2 = jax.random.uniform(k3, (HIDDEN, 1), jnp.float32, -lim2, lim2)
    b2 = jax.random.uniform(k4, (1, 1), jnp.float32, -lim2, lim2)
    gamma = jnp.ones((1, HIDDEN), jnp.float32)   # LayerNorm default weight
    beta = jnp.zeros((1, HIDDEN), jnp.float32)   # LayerNorm default bias
    return (w1, b1, w2, b2, gamma, beta)


def _reference_forward(x, params):
    """Pure-JAX reference (mirrors the PyTorch module exactly)."""
    w1, b1, w2, b2, gamma, beta = params
    h = jnp.squeeze(x, axis=1) @ w1 + b1
    h = jnp.where(h > 0, h, LEAKY_SLOPE * h)
    mean = jnp.mean(h, axis=-1, keepdims=True)
    var = jnp.mean((h - mean) ** 2, axis=-1, keepdims=True)
    h = (h - mean) / jnp.sqrt(var + LN_EPS) * gamma + beta
    return jax.nn.sigmoid(h @ w2 + b2)


if __name__ == "__main__":
    key = jax.random.PRNGKey(0)
    kp, kx = jax.random.split(key)

    batch = 8
    n_cities = 32

    params = init_params(kp, n_cities)
    x = jax.random.normal(kx, (batch, 1, n_cities), jnp.float32)

    ref = _reference_forward(x, params)

    # f32 path: tight-tolerance check against the reference.
    out_f32 = jax.block_until_ready(
        discriminator_forward(x, params, use_bf16=False))
    assert out_f32.shape == (batch, 1), out_f32.shape
    assert jnp.allclose(out_f32, ref, atol=1e-5, rtol=1e-5), (
        f"f32 max err {jnp.max(jnp.abs(out_f32 - ref))}")

    # Default (bf16 fc1) path: accumulation stays f32, looser tolerance.
    out = jax.block_until_ready(discriminator_forward(x, params))
    assert out.shape == (batch, 1), out.shape
    assert jnp.allclose(out, ref, atol=5e-3, rtol=0), (
        f"bf16 max err {jnp.max(jnp.abs(out - ref))}")

    print("KERNEL_OK")
</pallas_src>

<mosaic_0001>
module attributes {stable_mosaic.version = 11 : i64} {
  func.func @_discriminator_kernel(%arg0: i32, %arg1: memref<16x128xf32, #tpu.memory_space<vmem>>, %arg2: memref<128x128xf32, #tpu.memory_space<vmem>>, %arg3: memref<1x128xf32, #tpu.memory_space<vmem>>, %arg4: memref<1x128xf32, #tpu.memory_space<vmem>>, %arg5: memref<1x1xf32, #tpu.memory_space<smem>>, %arg6: memref<1x16xf32, #tpu.memory_space<vmem>>) attributes {dimension_semantics = [#tpu.dimension_semantics<parallel>], iteration_bounds = array<i64: 1>, scalar_prefetch = 0 : i64, scratch_operands = 0 : i64, tpu.core_type = #tpu.core_type<tc>, window_params = [{transform_indices = @transform_0, window_bounds = array<i64: 16, 128>}, {pipeline_mode = #tpu.pipeline_mode<synchronous>, transform_indices = @transform_1, window_bounds = array<i64: 128, 128>}, {pipeline_mode = #tpu.pipeline_mode<synchronous>, transform_indices = @transform_2, window_bounds = array<i64: 1, 128>}, {pipeline_mode = #tpu.pipeline_mode<synchronous>, transform_indices = @transform_3, window_bounds = array<i64: 1, 128>}, {transform_indices = @transform_4, window_bounds = array<i64: 1, 1>}, {transform_indices = @transform_5, window_bounds = array<i64: 1, 16>}]} {
    %c0 = arith.constant 0 : index
    %c0_0 = arith.constant 0 : index
    %0 = vector.load %arg1[%c0, %c0_0] : memref<16x128xf32, #tpu.memory_space<vmem>>, vector<16x128xf32>
    %c0_1 = arith.constant 0 : index
    %c0_2 = arith.constant 0 : index
    %1 = vector.load %arg2[%c0_1, %c0_2] : memref<128x128xf32, #tpu.memory_space<vmem>>, vector<128x128xf32>
    %cst = arith.constant dense<0.000000e+00> : vector<16x128xf32>
    %2 = tpu.matmul %0, %1, %cst {dimension_numbers = #tpu.dot_dimension_numbers<[1], [0], [0], [1], [0, 0, 1, 1], [], []>} : vector<16x128xf32>, vector<128x128xf32>, vector<16x128xf32> -> vector<16x128xf32>
    %c0_3 = arith.constant 0 : index
    %c0_4 = arith.constant 0 : index
    %3 = vector.load %arg3[%c0_3, %c0_4] : memref<1x128xf32, #tpu.memory_space<vmem>>, vector<1x128xf32>
    %4 = vector.broadcast %3 : vector<1x128xf32> to vector<16x128xf32>
    %5 = arith.addf %2, %4 : vector<16x128xf32>
    %cst_5 = arith.constant 2.000000e-01 : f32
    %6 = vector.broadcast %cst_5 : f32 to vector<16x128xf32>
    %7 = arith.mulf %6, %5 : vector<16x128xf32>
    %8 = arith.maximumf %5, %7 : vector<16x128xf32>
    %cst_6 = arith.constant dense<0.000000e+00> : vector<16xf32>
    %9 = vector.multi_reduction <add>, %8, %cst_6 [1] : vector<16x128xf32> to vector<16xf32>
    %10 = vector.shape_cast %9 : vector<16xf32> to vector<16x1xf32>
    %cst_7 = arith.constant 1.280000e+02 : f32
    %11 = vector.broadcast %cst_7 : f32 to vector<16x1xf32>
    %12 = arith.divf %10, %11 : vector<16x1xf32>
    %13 = vector.broadcast %12 : vector<16x1xf32> to vector<16x128xf32>
    %14 = arith.subf %8, %13 : vector<16x128xf32>
    %15 = arith.mulf %14, %14 : vector<16x128xf32>
    %cst_8 = arith.constant dense<0.000000e+00> : vector<16xf32>
    %16 = vector.multi_reduction <add>, %15, %cst_8 [1] : vector<16x128xf32> to vector<16xf32>
    %17 = vector.shape_cast %16 : vector<16xf32> to vector<16x1xf32>
    %cst_9 = arith.constant 1.280000e+02 : f32
    %18 = vector.broadcast %cst_9 : f32 to vector<16x1xf32>
    %19 = arith.divf %17, %18 : vector<16x1xf32>
    %cst_10 = arith.constant 9.99999974E-6 : f32
    %20 = vector.broadcast %cst_10 : f32 to vector<16x1xf32>
    %21 = arith.addf %19, %20 : vector<16x1xf32>
    %22 = math.rsqrt %21 : vector<16x1xf32>
    %23 = vector.broadcast %22 : vector<16x1xf32> to vector<16x128xf32>
    %24 = arith.mulf %14, %23 : vector<16x128xf32>
    %c0_11 = arith.constant 0 : index
    %c0_12 = arith.constant 0 : index
    %25 = vector.load %arg4[%c0_11, %c0_12] : memref<1x128xf32, #tpu.memory_space<vmem>>, vector<1x128xf32>
    %26 = vector.broadcast %25 : vector<1x128xf32> to vector<16x128xf32>
    %27 = arith.mulf %24, %26 : vector<16x128xf32>
    %cst_13 = arith.constant dense<0.000000e+00> : vector<16xf32>
    %28 = vector.multi_reduction <add>, %27, %cst_13 [1] : vector<16x128xf32> to vector<16xf32>
    %29 = vector.shape_cast %28 : vector<16xf32> to vector<16x1xf32>
    %c0_14 = arith.constant 0 : index
    %c0_15 = arith.constant 0 : index
    %30 = memref.load %arg5[%c0_14, %c0_15] : memref<1x1xf32, #tpu.memory_space<smem>>
    %31 = vector.broadcast %30 : f32 to vector<16x1xf32>
    %32 = arith.addf %29, %31 : vector<16x1xf32>
    %33 = arith.negf %32 : vector<16x1xf32>
    %34 = math.exp %33 : vector<16x1xf32>
    %cst_16 = arith.constant 1.000000e+00 : f32
    %35 = vector.broadcast %cst_16 : f32 to vector<16x1xf32>
    %36 = arith.addf %35, %34 : vector<16x1xf32>
    %37 = arith.divf %35, %36 : vector<16x1xf32>
    %38 = tpu.transpose %37, [1, 0] : vector<16x1xf32> -> vector<1x16xf32>
    %c0_17 = arith.constant 0 : index
    %c0_18 = arith.constant 0 : index
    %39 = vector.load %arg6[%c0_17, %c0_18] : memref<1x16xf32, #tpu.memory_space<vmem>>, vector<1x16xf32>
    tpu.vector_store %arg6[%c0_17, %c0_18], %38 {strides = array<i32>} : memref<1x16xf32, #tpu.memory_space<vmem>>, vector<1x16xf32>,
    return
  }
  func.func @transform_0(%arg0: i32) -> (i32, i32) {
    %c0_i32 = arith.constant 0 : i32
    %c0_i32_0 = arith.constant 0 : i32
    return %arg0, %c0_i32 : i32, i32
  }
  func.func @transform_1(%arg0: i32) -> (i32, i32) {
    %c0_i32 = arith.constant 0 : i32
    %c0_i32_0 = arith.constant 0 : i32
    %c0_i32_1 = arith.constant 0 : i32
    return %c0_i32, %c0_i32_0 : i32, i32
  }
  func.func @transform_2(%arg0: i32) -> (i32, i32) {
    %c0_i32 = arith.constant 0 : i32
    %c0_i32_0 = arith.constant 0 : i32
    %c0_i32_1 = arith.constant 0 : i32
    return %c0_i32, %c0_i32_0 : i32, i32
  }
  func.func @transform_3(%arg0: i32) -> (i32, i32) {
    %c0_i32 = arith.constant 0 : i32
    %c0_i32_0 = arith.constant 0 : i32
    %c0_i32_1 = arith.constant 0 : i32
    return %c0_i32, %c0_i32_0 : i32, i32
  }
  func.func @transform_4(%arg0: i32) -> (i32, i32) {
    %c0_i32 = arith.constant 0 : i32
    %c0_i32_0 = arith.constant 0 : i32
    %c0_i32_1 = arith.constant 0 : i32
    return %c0_i32, %c0_i32_0 : i32, i32
  }
  func.func @transform_5(%arg0: i32) -> (i32, i32) {
    %c0_i32 = arith.constant 0 : i32
    %c0_i32_0 = arith.constant 0 : i32
    return %arg0, %c0_i32 : i32, i32
  }
}

</mosaic_0001>

<bundles_post_ra>
// kernel: discriminator_forward.1
= control target key start
LH: loop header
LB: loop body
LE: loop exit
PB: predicated region body
PF: predicated region fallthrough
CT: control target
= control target key end

     0   :  { %v243_v27 = vmov 128.0   ;;  %vm201_vm15 = vcmask 122880   ;;  %s340_s1 = inlined_call_operand.vmem [shape: f32[128,128], index: 1, kind: input, shape index: {}]   ;;  %s341_s2 = inlined_call_operand.vmem [shape: f32[1,128], index: 2, kind: input, shape index: {}]   ;;  %s342_s0 = inlined_call_operand.vmem [shape: f32[16,128], index: 0, kind: input, shape index: {}]   ;;  %s343_s3 = inlined_call_operand.vmem [shape: f32[1,128], index: 3, kind: input, shape index: {}]   ;;  %s344_s4 = inlined_call_operand.<no memory space> [shape: f32[1,1], index: 4, kind: input, shape index: {}]   ;;  %s345_s5 = inlined_call_operand.vmem [shape: f32[1,16], index: 5, kind: output, shape index: {}]  }
   0x1   :  { %v38_v0 = vld [vmem:[%s340_s1 + $0x78] sm:$0xff]  ;;  %v37_v1 = vld [vmem:[%s340_s1 + $0x70] sm:$0xff]  ;;  %v36_v2 = vld [vmem:[%s340_s1 + $0x68] sm:$0xff]  ;;  %229 = vrcp.f32 %v243_v27 }
   0x2   :  { %43 = vmatpush.msra.mxu0 %v38_v0  ;;  %209 = vmatpush.msra.mxu1 %v38_v0  ;;  %v35_v3 = vld [vmem:[%s340_s1 + $0x60] sm:$0xff]  ;;  %v34_v4 = vld [vmem:[%s340_s1 + $0x58] sm:$0xff]  ;;  %v33_v5 = vld [vmem:[%s340_s1 + $0x50] sm:$0xff] }
   0x3   :  { %v32_v6 = vld [vmem:[%s340_s1 + $0x48] sm:$0xff]  ;;  %v31_v7 = vld [vmem:[%s340_s1 + $0x40] sm:$0xff]  ;;  %v30_v8 = vld [vmem:[%s340_s1 + $0x38] sm:$0xff] }
   0x4   :  { %44 = vmatpush.msra.mxu0 %v37_v1  ;;  %210 = vmatpush.msra.mxu1 %v37_v1  ;;  %v29_v9 = vld [vmem:[%s340_s1 + $0x30] sm:$0xff]  ;;  %v28_v10 = vld [vmem:[%s340_s1 + $0x28] sm:$0xff]  ;;  %v27_v11 = vld [vmem:[%s340_s1 + $0x20] sm:$0xff] }
   0x5   :  { %v26_v12 = vld [vmem:[%s340_s1 + $0x18] sm:$0xff]  ;;  %v25_v13 = vld [vmem:[%s340_s1 + $0x10] sm:$0xff]  ;;  %v24_v14 = vld [vmem:[%s340_s1 + $0x8] sm:$0xff] }
   0x6   :  { %45 = vmatpush.msra.mxu0 %v36_v2  ;;  %211 = vmatpush.msra.mxu1 %v36_v2  ;;  %v23_v15 = vld [vmem:[%s340_s1] sm:$0xff]  ;;  %v22_v17 = vld [vmem:[%s342_s0 + $0x8] sm:$0xff] }
   0x7   :  { %v21_v16 = vld [vmem:[%s342_s0] sm:$0xff]  ;;  %v230_v28 = vpop.eup %229 }
   0x8   :  { %46 = vmatpush.msra.mxu0 %v35_v3  ;;  %212 = vmatpush.msra.mxu1 %v35_v3  ;;  %v227_v18 = vld [vmem:[%s341_s2] ss:$0 sm:$0xff]  ;;  %v75_v29 = vmul.f32 128.0, %v230_v28  ;;  %vm79_vm0 = vweird.f32 %v230_v28  ;;  %v128_v3 = vstv %s344_s4 }
   0x9   :  { %v228_v56 = vld [vmem:[%s343_s3] ss:$0 sm:$0xff] }
   0xa   :  { %47 = vmatpush.msra.mxu0 %v34_v4  ;;  %213 = vmatpush.msra.mxu1 %v34_v4  ;;  %v76_v30 = vsub.f32 1.0, %v75_v29 }
   0xc   :  { %48 = vmatpush.msra.mxu0 %v33_v5  ;;  %214 = vmatpush.msra.mxu1 %v33_v5  ;;  %v77_v31 = vmul.f32 %v230_v28, %v76_v30 }
   0xe   :  { %49 = vmatpush.msra.mxu0 %v32_v6  ;;  %215 = vmatpush.msra.mxu1 %v32_v6  ;;  %v78_v32 = vadd.f32 %v230_v28, %v77_v31 }
  0x10   :  { %50 = vmatpush.msra.mxu0 %v31_v7  ;;  %216 = vmatpush.msra.mxu1 %v31_v7  ;;  %v80_v33 = vsel %vm79_vm0, %v230_v28, %v78_v32 }
  0x12   :  { %51 = vmatpush.msra.mxu0 %v30_v8  ;;  %217 = vmatpush.msra.mxu1 %v30_v8 }
  0x14   :  { %52 = vmatpush.msra.mxu0 %v29_v9  ;;  %218 = vmatpush.msra.mxu1 %v29_v9 }
  0x16   :  { %53 = vmatpush.msra.mxu0 %v28_v10  ;;  %219 = vmatpush.msra.mxu1 %v28_v10 }
  0x18   :  { %54 = vmatpush.msra.mxu0 %v27_v11  ;;  %220 = vmatpush.msra.mxu1 %v27_v11 }
  0x1a   :  { %55 = vmatpush.msra.mxu0 %v26_v12  ;;  %221 = vmatpush.msra.mxu1 %v26_v12 }
  0x1c   :  { %56 = vmatpush.msra.mxu0 %v25_v13  ;;  %222 = vmatpush.msra.mxu1 %v25_v13 }
  0x1e   :  { %57 = vmatpush.msra.mxu0 %v24_v14  ;;  %223 = vmatpush.msra.mxu1 %v24_v14 }
  0x20   :  { %58 = vmatpush.msra.mxu0 %v23_v15  ;;  %224 = vmatpush.msra.mxu1 %v23_v15 }
  0x21   :  { %59 = vmatmul.f32.vlgmr.msra.gmra.mxu0 %v21_v16  ;;  %62 = vmatmul.f32.vlgmr.msra.gmra.mxu1 %v22_v17 }
  0x9e   :  { %v60_v19 = vpop.f32.mrf.mxu0  ;;  %v63_v21 = vpop.f32.mrf.mxu1 }
  0x9f   :  { %v61_v20 = vadd.f32 %v227_v18, %v60_v19  ;;  %v64_v23 = vadd.f32 %v227_v18, %v63_v21 }
  0xa1   :  { %v66_v22 = vmul.f32 0.2, %v61_v20  ;;  %v67_v25 = vmul.f32 0.2, %v64_v23 }
  0xa3   :  { %v68_v24 = vmax.f32 %v61_v20, %v66_v22  ;;  %v69_v26 = vmax.f32 %v64_v23, %v67_v25 }
  0xa5   :  { %70 = vadd.xlane.f32.xlu0 %v68_v24 }
  0xad   :  { %72 = vadd.xlane.f32.xlu0 %v69_v26 }
 0x118   :  { %v71_v34 = vpop.xlane.xlu0 %70 }
 0x119   :  { %v81_v35 = vmul.f32 %v80_v33, %v71_v34 }
 0x11b   :  { %v83_v36 = vsub.f32 %v68_v24, %v81_v35 }
 0x11d   :  { %v85_v37 = vmul.f32 %v83_v36, %v83_v36 }
 0x11f   :  { %87 = vadd.xlane.f32.xlu1 %v85_v37 }
 0x120   :  { %v73_v38 = vpop.xlane.xlu0 %72 }
 0x121   :  { %v82_v39 = vmul.f32 %v80_v33, %v73_v38 }
 0x123   :  { %v84_v40 = vsub.f32 %v69_v26, %v82_v39 }
 0x125   :  { %v86_v41 = vmul.f32 %v84_v40, %v84_v40 }
 0x127   :  { %89 = vadd.xlane.f32.xlu1 %v86_v41 }
 0x192   :  { %v88_v42 = vpop.xlane.xlu1 %87 }
 0x193   :  { %v91_v43 = vmul.f32 %v88_v42, %v80_v33 }
 0x195   :  { %v93_v44 = vadd.f32 1e-05, %v91_v43 }
 0x197   :  { %231 = vrsqrt.f32 %v93_v44  ;;  %vm101_vm2 = vweird.f32 %v93_v44 }
 0x19a   :  { %v90_v45 = vpop.xlane.xlu1 %89 }
 0x19b   :  { %v92_v46 = vmul.f32 %v90_v45, %v80_v33 }
 0x19d   :  { %v232_v47 = vpop.eup %231  ;;  %v94_v48 = vadd.f32 1e-05, %v92_v46 }
 0x19e   :  { %v96_v49 = vmul.f32 %v232_v47, %v93_v44  ;;  %vm102_vm1 = vweird.f32 %v232_v47 }
 0x19f   :  { %233 = vrsqrt.f32 %v94_v48  ;;  %vm103_vm3 = vmor %vm101_vm2, %vm102_vm1  ;;  %vm111_vm5 = vweird.f32 %v94_v48 }
 0x1a0   :  { %v97_v50 = vmul.f32 %v232_v47, %v96_v49 }
 0x1a2   :  { %v98_v51 = vmul.f32 0.5, %v97_v50 }
 0x1a4   :  { %v99_v52 = vsub.f32 1.5, %v98_v51 }
 0x1a5   :  { %v234_v53 = vpop.eup %233 }
 0x1a6   :  { %v106_v54 = vmul.f32 %v234_v53, %v94_v48  ;;  %v100_v55 = vmul.f32 %v232_v47, %v99_v52  ;;  %vm112_vm4 = vweird.f32 %v234_v53 }
 0x1a7   :  { %vm113_vm6 = vmor %vm111_vm5, %vm112_vm4 }
 0x1a8   :  { %v107_v57 = vmul.f32 %v234_v53, %v106_v54  ;;  %v104_v58 = vsel %vm103_vm3, %v232_v47, %v100_v55 }
 0x1a9   :  { %v115_v59 = vmul.f32 %v104_v58, %v83_v36 }
 0x1aa   :  { %v108_v60 = vmul.f32 0.5, %v107_v57 }
 0x1ab   :  { %v121_v61 = vmul.f32 %v228_v56, %v115_v59 }
 0x1ac   :  { %v109_v62 = vsub.f32 1.5, %v108_v60 }
 0x1ad   :  { %123 = vadd.xlane.f32.xlu2 %v121_v61 }
 0x1ae   :  { %v110_v63 = vmul.f32 %v234_v53, %v109_v62 }
 0x1b0   :  { %v114_v0 = vsel %vm113_vm6, %v234_v53, %v110_v63 }
 0x1b1   :  { %v116_v1 = vmul.f32 %v114_v0, %v84_v40 }
 0x1b3   :  { %v122_v2 = vmul.f32 %v228_v56, %v116_v1 }
 0x1b5   :  { %125 = vadd.xlane.f32.xlu2 %v122_v2 }
 0x220   :  { %v124_v4 = vpop.xlane.xlu2 %123 }
 0x221   :  { %v129_v5 = vadd.f32 %v128_v3, %v124_v4 }
 0x223   :  { %v207_v6 = vmul.f32 -1.442695, %v129_v5 }
 0x225   :  { %235 = vpow2.f32 %v207_v6 }
 0x228   :  { %v126_v7 = vpop.xlane.xlu2 %125 }
 0x229   :  { %v130_v8 = vadd.f32 %v128_v3, %v126_v7 }
 0x22b   :  { %v236_v9 = vpop.eup %235  ;;  %v208_v10 = vmul.f32 -1.442695, %v130_v8 }
 0x22c   :  { %v137_v11 = vadd.f32 1.0, %v236_v9 }
 0x22d   :  { %237 = vpow2.f32 %v208_v10 }
 0x22e   :  { %239 = vrcp.f32 %v137_v11  ;;  %v150_v17 = vand.u32 2147483648, %v137_v11  ;;  %v148_v19 = vand.u32 2147483647, %v137_v11  ;;  %vm144_vm8 = vweird.f32 %v137_v11 }
 0x230   :  { %v151_v22 = vor.u32 1.1754944e-38, %v150_v17  ;;  %vm149_vm10 = vcmp.eq.f32.partialorder %v148_v19, 8.507059e+37 }
 0x233   :  { %v238_v12 = vpop.eup %237 }
 0x234   :  { %v240_v13 = vpop.eup %239  ;;  %v138_v14 = vadd.f32 1.0, %v238_v12 }
 0x235   :  { %v140_v15 = vmul.f32 %v240_v13, %v137_v11  ;;  %vm145_vm7 = vweird.f32 %v240_v13 }
 0x236   :  { %241 = vrcp.f32 %v138_v14  ;;  %vm146_vm9 = vmor %vm144_vm8, %vm145_vm7  ;;  %v165_v27 = vand.u32 2147483648, %v138_v14  ;;  %v163_v29 = vand.u32 2147483647, %v138_v14  ;;  %vm159_vm12 = vweird.f32 %v138_v14 }
 0x237   :  { %v141_v16 = vsub.f32 1.0, %v140_v15 }
 0x238   :  { %v166_v31 = vor.u32 1.1754944e-38, %v165_v27  ;;  %vm164_vm14 = vcmp.eq.f32.partialorder %v163_v29, 8.507059e+37 }
 0x239   :  { %v142_v18 = vmul.f32 %v240_v13, %v141_v16 }
 0x23b   :  { %v143_v20 = vadd.f32 %v240_v13, %v142_v18 }
 0x23c   :  { %v242_v21 = vpop.eup %241 }
 0x23d   :  { %v147_v23 = vsel %vm146_vm9, %v240_v13, %v143_v20  ;;  %v155_v24 = vmul.f32 %v242_v21, %v138_v14  ;;  %vm160_vm11 = vweird.f32 %v242_v21 }
 0x23e   :  { %v152_v25 = vsel %vm149_vm10, %v151_v22, %v147_v23  ;;  %vm161_vm13 = vmor %vm159_vm12, %vm160_vm11 }
 0x23f   :  { %169 = vxpose.xlu0.b32.start [1/2] (short) (narrow) %v152_v25, 8  ;;  %v156_v26 = vsub.f32 1.0, %v155_v24 }
 0x241   :  { %v157_v28 = vmul.f32 %v242_v21, %v156_v26 }
 0x243   :  { %v158_v30 = vadd.f32 %v242_v21, %v157_v28 }
 0x245   :  { %v162_v32 = vsel %vm161_vm13, %v242_v21, %v158_v30 }
 0x246   :  { %v167_v33 = vsel %vm164_vm14, %v166_v31, %v162_v32 }
 0x247   :  { %170 = vxpose.xlu0.b32.end [2/2] (short) (narrow) %v167_v33, 8 }
 0x2e3   :  { %v185_v34 = vpop.trf.xlu0 }
 0x2e4   :  { %202 = vst.msk [vmem:[%s345_s5] sm:$0x1] %vm201_vm15, %v185_v34 }

</bundles_post_ra>
